<compile_context>
chip_gen: v7x
topology: tpu7x:2x2x1
jax: 0.10.0
libtpu: 0.0.40
codegen_flags: <defaults>
</compile_context>

<pallas_src>
import functools

import jax
import jax.numpy as jnp
import numpy as np
from jax import lax
from jax.experimental import pallas as pl
from jax.experimental.pallas import tpu as pltpu


def _vq_kernel(z_ref, cbn2_ref, cbt_ref, csq_ref,
               zq_ref, cnt_ref, sse_ref, *, hw, t, need_mask):
    j = pl.program_id(1)

    z = z_ref[...].astype(jnp.float32)        # (D, t)  lane-dense stream
    cb_neg2 = cbn2_ref[...]                   # (K, D)  resident, = -2 * codebook
    cb_t = cbt_ref[...]                       # (D, K)  resident, = codebook^T
    csq = csq_ref[...]                        # (K, 1)  resident, = ||c_k||^2

    K = cb_neg2.shape[0]

    # d[k, n] = ||c_k||^2 - 2 * c_k . z_n   (||z_n||^2 dropped: argmin-invariant)
    score = csq + jnp.dot(cb_neg2, z, preferred_element_type=jnp.float32)  # (K, t)

    # argmin over the code (sublane) axis, first-match tie-break (torch.argmin).
    row = lax.broadcasted_iota(jnp.int32, score.shape, 0)                  # (K, t)
    s_min = jnp.min(score, axis=0, keepdims=True)                          # (1, t)
    idx = jnp.min(jnp.where(score == s_min, row, K), axis=0, keepdims=True)
    one_hot = (row == idx).astype(jnp.float32)                             # (K, t), VMEM only

    # z_q = codebook^T @ one_hot   (MXU), lane-dense store.
    z_q = jnp.dot(cb_t, one_hot, preferred_element_type=jnp.float32)       # (D, t)
    zq_ref[...] = z_q.astype(zq_ref.dtype)

    diff = z_q - z
    if need_mask:
        # Last HW tile may be partial: out-of-bounds columns hold garbage
        # (never padded in HBM), so mask with jnp.where (NaN-safe), not *.
        col = j * t + lax.broadcasted_iota(jnp.int32, (1, t), 1)
        valid = col < hw
        one_hot = jnp.where(valid, one_hot, 0.0)
        diff = jnp.where(valid, diff, 0.0)

    # Per-tile partials (streamed out; tiny), reduced in the JAX glue.
    cnt_ref[...] = jnp.sum(one_hot, axis=1, keepdims=True)                 # (K, 1)
    sse_ref[...] = jnp.sum(diff * diff, axis=1, keepdims=True)             # (D, 1)


def vector_quantizer_forward(x_nchw, codebook, *, beta=0.25, flg_train=True,
                             t_hw=1024):
    """Equivalent of VectorQuantizer.forward (== _quantize), forward values only."""
    B, D, H, W = x_nchw.shape
    K, Dc = codebook.shape
    assert D == Dc
    assert t_hw % 128 == 0, "HW tile must be a multiple of 128 (lane width)"

    HW = H * W
    N = B * HW

    # NCHW is already channel-major: (B, D, H*W) is a free, contiguous reshape.
    z3 = x_nchw.reshape(B, D, HW)

    t = t_hw if HW >= t_hw else HW            # full-dim block when HW is small
    n_hw = pl.cdiv(HW, t)
    need_mask = (n_hw * t != HW)              # ragged last tile -> in-kernel mask

    cb32 = codebook.astype(jnp.float32)
    cb_neg2 = -2.0 * cb32                                    # (K, D)
    cb_t = cb32.T                                            # (D, K)
    c_sq = jnp.sum(cb32 * cb32, axis=1, keepdims=True)       # (K, 1)

    kernel = functools.partial(_vq_kernel, hw=HW, t=t, need_mask=need_mask)

    cost = pl.CostEstimate(
        flops=int(4 * N * K * D),                            # two matmuls / column
        transcendentals=0,
        bytes_accessed=int(2 * N * D * x_nchw.dtype.itemsize
                           + 2 * K * D * 4 + K * 4
                           + B * n_hw * (K + D) * 4),
    )

    zq3, cnt, sse = pl.pallas_call(
        kernel,
        out_shape=(
            jax.ShapeDtypeStruct((B, D, HW), x_nchw.dtype),
            jax.ShapeDtypeStruct((B, n_hw, K, 1), jnp.float32),
            jax.ShapeDtypeStruct((B, n_hw, D, 1), jnp.float32),
        ),
        grid_spec=pltpu.PrefetchScalarGridSpec(
            num_scalar_prefetch=0,
            grid=(B, n_hw),
            in_specs=[
                pl.BlockSpec((None, D, t), lambda b, j: (b, 0, j)),   # z (streamed)
                pl.BlockSpec((K, D), lambda b, j: (0, 0)),            # -2*codebook (resident)
                pl.BlockSpec((D, K), lambda b, j: (0, 0)),            # codebook^T (resident)
                pl.BlockSpec((K, 1), lambda b, j: (0, 0)),            # ||c||^2 (resident)
            ],
            out_specs=(
                pl.BlockSpec((None, D, t), lambda b, j: (b, 0, j)),   # z_q (streamed)
                pl.BlockSpec((None, None, K, 1), lambda b, j: (b, j, 0, 0)),
                pl.BlockSpec((None, None, D, 1), lambda b, j: (b, j, 0, 0)),
            ),
        ),
        # No resident accumulators -> both axes fully parallel (v7x: 2 TCs split
        # the whole grid; no-op on single-core v5e/v6e).
        compiler_params=pltpu.CompilerParams(
            dimension_semantics=("parallel", "parallel")),
        cost_estimate=cost,
    )(z3, cb_neg2, cb_t, c_sq)

    counts = jnp.sum(cnt[..., 0], axis=(0, 1))               # (K,)  exact ints in f32
    sse_total = jnp.sum(sse)

    # loss: beta*mean((sg(zq)-z)^2) + mean((zq-sg(z))^2)
    # forward value == (beta + 1) * mean((zq - z)^2)
    if flg_train:
        loss = (beta + 1.0) * sse_total / (N * D)
    else:
        loss = jnp.float32(0.0)

    e_mean = counts / N
    perplexity = jnp.exp(-jnp.sum(e_mean * jnp.log(e_mean + 1e-10)))

    # straight-through: z + sg(z_q - z) -> forward value is z_q (already NCHW).
    z_q = zq3.reshape(B, D, H, W)
    return z_q, loss, perplexity


def _reference_forward(x_nchw, codebook, beta=0.25):
    """Pure-JAX reference mirroring the PyTorch code, for a sanity check."""
    B, D, H, W = x_nchw.shape
    K = codebook.shape[0]
    z = jnp.transpose(x_nchw, (0, 2, 3, 1)).reshape(-1, D).astype(jnp.float32)
    cb = codebook.astype(jnp.float32)
    d = (jnp.sum(z ** 2, axis=1, keepdims=True) + jnp.sum(cb ** 2, axis=1)
         - 2.0 * z @ cb.T)
    idx = jnp.argmin(d, axis=1)
    enc = jax.nn.one_hot(idx, K, dtype=jnp.float32)
    z_q = enc @ cb
    loss = beta * jnp.mean((z_q - z) ** 2) + jnp.mean((z_q - z) ** 2)
    e_mean = jnp.mean(enc, axis=0)
    perp = jnp.exp(-jnp.sum(e_mean * jnp.log(e_mean + 1e-10)))
    z_q = jnp.transpose(z_q.reshape(B, H, W, D), (0, 3, 1, 2))
    return z_q, loss, perp


def _check(B, D, H, W, K, seed, t_hw):
    key = jax.random.PRNGKey(seed)
    kx, kc = jax.random.split(key)
    x = jax.random.normal(kx, (B, D, H, W), dtype=jnp.float32)
    codebook = jax.random.normal(kc, (K, D), dtype=jnp.float32) * 0.5

    z_q, loss, perplexity = vector_quantizer_forward(
        x, codebook, beta=0.25, flg_train=True, t_hw=t_hw)
    jax.block_until_ready((z_q, loss, perplexity))

    zq_ref, loss_ref, perp_ref = _reference_forward(x, codebook, beta=0.25)
    assert z_q.shape == (B, D, H, W)
    np.testing.assert_allclose(np.asarray(z_q), np.asarray(zq_ref),
                               rtol=1e-5, atol=1e-5)
    np.testing.assert_allclose(float(loss), float(loss_ref), rtol=1e-5, atol=1e-6)
    np.testing.assert_allclose(float(perplexity), float(perp_ref),
                               rtol=1e-5, atol=1e-5)


if __name__ == "__main__":
    # size_dict (K) = 128 codes, dim_dict (D) = 32
    # config 1: HW = 256, t=128 -> two HW tiles per batch, no masking
    _check(B=2, D=32, H=16, W=16, K=128, seed=0, t_hw=128)
    # config 2: HW = 144, t=128 -> ragged last tile, in-kernel jnp.where masking
    _check(B=2, D=32, H=12, W=12, K=128, seed=1, t_hw=128)
    # config 3: default tile (HW < t_hw -> single full-dim block per batch)
    _check(B=2, D=32, H=16, W=16, K=128, seed=2, t_hw=1024)
    print("KERNEL_OK")
</pallas_src>

<mosaic_0001>
module attributes {stable_mosaic.version = 11 : i64} {
  func.func @_vq_kernel(%arg0: i32, %arg1: i32, %arg2: memref<1x32x128xf32, #tpu.memory_space<vmem>>, %arg3: memref<128x32xf32, #tpu.memory_space<vmem>>, %arg4: memref<32x128xf32, #tpu.memory_space<vmem>>, %arg5: memref<128x1xf32, #tpu.memory_space<vmem>>, %arg6: memref<1x32x128xf32, #tpu.memory_space<vmem>>, %arg7: memref<1x1x128x1xf32, #tpu.memory_space<vmem>>, %arg8: memref<1x1x32x1xf32, #tpu.memory_space<vmem>>) attributes {dimension_semantics = [#tpu.dimension_semantics<parallel>, #tpu.dimension_semantics<parallel>], iteration_bounds = array<i64: 2, 2>, scalar_prefetch = 0 : i64, scratch_operands = 0 : i64, tpu.core_type = #tpu.core_type<tc>, window_params = [{transform_indices = @transform_0, window_bounds = array<i64: 1, 32, 128>}, {pipeline_mode = #tpu.pipeline_mode<synchronous>, transform_indices = @transform_1, window_bounds = array<i64: 128, 32>}, {pipeline_mode = #tpu.pipeline_mode<synchronous>, transform_indices = @transform_2, window_bounds = array<i64: 32, 128>}, {pipeline_mode = #tpu.pipeline_mode<synchronous>, transform_indices = @transform_3, window_bounds = array<i64: 128, 1>}, {transform_indices = @transform_4, window_bounds = array<i64: 1, 32, 128>}, {transform_indices = @transform_5, window_bounds = array<i64: 1, 1, 128, 1>}, {transform_indices = @transform_6, window_bounds = array<i64: 1, 1, 32, 1>}]} {
    %c0 = arith.constant 0 : index
    %c0_0 = arith.constant 0 : index
    %c0_1 = arith.constant 0 : index
    %0 = vector.load %arg2[%c0, %c0_0, %c0_1] : memref<1x32x128xf32, #tpu.memory_space<vmem>>, vector<1x32x128xf32>
    %1 = vector.shape_cast %0 : vector<1x32x128xf32> to vector<32x128xf32>
    %c0_2 = arith.constant 0 : index
    %c0_3 = arith.constant 0 : index
    %2 = vector.load %arg3[%c0_2, %c0_3] : memref<128x32xf32, #tpu.memory_space<vmem>>, vector<128x32xf32>
    %c0_4 = arith.constant 0 : index
    %c0_5 = arith.constant 0 : index
    %3 = vector.load %arg4[%c0_4, %c0_5] : memref<32x128xf32, #tpu.memory_space<vmem>>, vector<32x128xf32>
    %c0_6 = arith.constant 0 : index
    %c0_7 = arith.constant 0 : index
    %4 = vector.load %arg5[%c0_6, %c0_7] : memref<128x1xf32, #tpu.memory_space<vmem>>, vector<128x1xf32>
    %cst = arith.constant dense<0.000000e+00> : vector<128x128xf32>
    %5 = tpu.matmul %2, %1, %cst {dimension_numbers = #tpu.dot_dimension_numbers<[1], [0], [0], [1], [0, 0, 1, 1], [], []>} : vector<128x32xf32>, vector<32x128xf32>, vector<128x128xf32> -> vector<128x128xf32>
    %6 = vector.broadcast %4 : vector<128x1xf32> to vector<128x128xf32>
    %7 = arith.addf %6, %5 : vector<128x128xf32>
    %8 = tpu.iota {dimensions = array<i32: 0>} : vector<128x128xi32>
    %cst_8 = arith.constant dense<0x7F800000> : vector<128xf32>
    %9 = vector.multi_reduction <minimumf>, %7, %cst_8 [0] : vector<128x128xf32> to vector<128xf32>
    %10 = vector.shape_cast %9 : vector<128xf32> to vector<1x128xf32>
    %11 = vector.broadcast %10 : vector<1x128xf32> to vector<128x128xf32>
    %12 = arith.cmpf oeq, %7, %11 : vector<128x128xf32>
    %c128_i32 = arith.constant 128 : i32
    %13 = vector.broadcast %c128_i32 : i32 to vector<128x128xi32>
    %14 = arith.select %12, %8, %13 : vector<128x128xi1>, vector<128x128xi32>
    %cst_9 = arith.constant dense<2147483647> : vector<128xi32>
    %15 = vector.multi_reduction <minsi>, %14, %cst_9 [0] : vector<128x128xi32> to vector<128xi32>
    %16 = vector.shape_cast %15 : vector<128xi32> to vector<1x128xi32>
    %17 = vector.broadcast %16 : vector<1x128xi32> to vector<128x128xi32>
    %18 = arith.cmpi eq, %8, %17 : vector<128x128xi32>
    %19 = arith.extui %18 : vector<128x128xi1> to vector<128x128xi32>
    %20 = arith.sitofp %19 : vector<128x128xi32> to vector<128x128xf32>
    %cst_10 = arith.constant dense<0.000000e+00> : vector<32x128xf32>
    %21 = tpu.matmul %3, %20, %cst_10 {dimension_numbers = #tpu.dot_dimension_numbers<[1], [0], [0], [1], [0, 0, 1, 1], [], []>} : vector<32x128xf32>, vector<128x128xf32>, vector<32x128xf32> -> vector<32x128xf32>
    %c0_11 = arith.constant 0 : index
    %c0_12 = arith.constant 0 : index
    %c0_13 = arith.constant 0 : index
    %22 = vector.load %arg6[%c0_11, %c0_12, %c0_13] : memref<1x32x128xf32, #tpu.memory_space<vmem>>, vector<1x32x128xf32>
    %23 = vector.shape_cast %22 : vector<1x32x128xf32> to vector<32x128xf32>
    %24 = vector.shape_cast %21 : vector<32x128xf32> to vector<1x32x128xf32>
    tpu.vector_store %arg6[%c0_11, %c0_12, %c0_13], %24 {strides = array<i32>} : memref<1x32x128xf32, #tpu.memory_space<vmem>>, vector<1x32x128xf32>,
    %25 = arith.subf %21, %1 : vector<32x128xf32>
    %cst_14 = arith.constant dense<0.000000e+00> : vector<128xf32>
    %26 = vector.multi_reduction <add>, %20, %cst_14 [1] : vector<128x128xf32> to vector<128xf32>
    %27 = vector.shape_cast %26 : vector<128xf32> to vector<128x1xf32>
    %c0_15 = arith.constant 0 : index
    %c0_16 = arith.constant 0 : index
    %c0_17 = arith.constant 0 : index
    %c0_18 = arith.constant 0 : index
    %28 = vector.load %arg7[%c0_15, %c0_16, %c0_17, %c0_18] : memref<1x1x128x1xf32, #tpu.memory_space<vmem>>, vector<1x1x128x1xf32>
    %29 = vector.shape_cast %28 : vector<1x1x128x1xf32> to vector<128x1xf32>
    %30 = vector.shape_cast %27 : vector<128x1xf32> to vector<1x1x128x1xf32>
    tpu.vector_store %arg7[%c0_15, %c0_16, %c0_17, %c0_18], %30 {strides = array<i32>} : memref<1x1x128x1xf32, #tpu.memory_space<vmem>>, vector<1x1x128x1xf32>,
    %31 = arith.mulf %25, %25 : vector<32x128xf32>
    %cst_19 = arith.constant dense<0.000000e+00> : vector<32xf32>
    %32 = vector.multi_reduction <add>, %31, %cst_19 [1] : vector<32x128xf32> to vector<32xf32>
    %33 = vector.shape_cast %32 : vector<32xf32> to vector<32x1xf32>
    %c0_20 = arith.constant 0 : index
    %c0_21 = arith.constant 0 : index
    %c0_22 = arith.constant 0 : index
    %c0_23 = arith.constant 0 : index
    %34 = vector.load %arg8[%c0_20, %c0_21, %c0_22, %c0_23] : memref<1x1x32x1xf32, #tpu.memory_space<vmem>>, vector<1x1x32x1xf32>
    %35 = vector.shape_cast %34 : vector<1x1x32x1xf32> to vector<32x1xf32>
    %36 = vector.shape_cast %33 : vector<32x1xf32> to vector<1x1x32x1xf32>
    tpu.vector_store %arg8[%c0_20, %c0_21, %c0_22, %c0_23], %36 {strides = array<i32>} : memref<1x1x32x1xf32, #tpu.memory_space<vmem>>, vector<1x1x32x1xf32>,
    return
  }
  func.func @transform_0(%arg0: i32, %arg1: i32) -> (i32, i32, i32) {
    %c0_i32 = arith.constant 0 : i32
    %c0_i32_0 = arith.constant 0 : i32
    return %arg0, %c0_i32, %arg1 : i32, i32, i32
  }
  func.func @transform_1(%arg0: i32, %arg1: i32) -> (i32, i32) {
    %c0_i32 = arith.constant 0 : i32
    %c0_i32_0 = arith.constant 0 : i32
    %c0_i32_1 = arith.constant 0 : i32
    return %c0_i32, %c0_i32_0 : i32, i32
  }
  func.func @transform_2(%arg0: i32, %arg1: i32) -> (i32, i32) {
    %c0_i32 = arith.constant 0 : i32
    %c0_i32_0 = arith.constant 0 : i32
    %c0_i32_1 = arith.constant 0 : i32
    return %c0_i32, %c0_i32_0 : i32, i32
  }
  func.func @transform_3(%arg0: i32, %arg1: i32) -> (i32, i32) {
    %c0_i32 = arith.constant 0 : i32
    %c0_i32_0 = arith.constant 0 : i32
    %c0_i32_1 = arith.constant 0 : i32
    return %c0_i32, %c0_i32_0 : i32, i32
  }
  func.func @transform_4(%arg0: i32, %arg1: i32) -> (i32, i32, i32) {
    %c0_i32 = arith.constant 0 : i32
    %c0_i32_0 = arith.constant 0 : i32
    return %arg0, %c0_i32, %arg1 : i32, i32, i32
  }
  func.func @transform_5(%arg0: i32, %arg1: i32) -> (i32, i32, i32, i32) {
    %c0_i32 = arith.constant 0 : i32
    %c0_i32_0 = arith.constant 0 : i32
    %c0_i32_1 = arith.constant 0 : i32
    return %arg0, %arg1, %c0_i32, %c0_i32_0 : i32, i32, i32, i32
  }
  func.func @transform_6(%arg0: i32, %arg1: i32) -> (i32, i32, i32, i32) {
    %c0_i32 = arith.constant 0 : i32
    %c0_i32_0 = arith.constant 0 : i32
    %c0_i32_1 = arith.constant 0 : i32
    return %arg0, %arg1, %c0_i32, %c0_i32_0 : i32, i32, i32, i32
  }
}

</mosaic_0001>

<bundles_post_ra>
// kernel: tpu_custom_call.1
= control target key start
LH: loop header
LB: loop body
LE: loop exit
PB: predicated region body
PF: predicated region fallthrough
CT: control target
= control target key end

     0   :  { %s2214_s0 = inlined_call_operand.vmem [shape: f32[2,32,256], index: 0, kind: input, shape index: {}]   ;;  %s2215_s1 = inlined_call_operand.vmem [shape: f32[128,32], index: 1, kind: input, shape index: {}]   ;;  %s2216_s2 = inlined_call_operand.vmem [shape: f32[32,128], index: 2, kind: input, shape index: {}]   ;;  %s2217_s3 = inlined_call_operand.vmem [shape: f32[128,1], index: 3, kind: input, shape index: {}]   ;;  %s2218_s4 = inlined_call_operand.hbm [shape: f32[2,32,256], index: 4, kind: output, shape index: {0}]   ;;  %s2219_s5 = inlined_call_operand.vmem [shape: f32[2,2,128,1], index: 5, kind: output, shape index: {1}]   ;;  %s2220_s6 = inlined_call_operand.vmem [shape: f32[2,2,32,1], index: 6, kind: output, shape index: {2}]  }
   0x1   :  { %2222 = sst [smem:[#allocation6_spill]] %s2214_s0 }
   0x2   :  { %2223 = sst [smem:[#allocation7_spill]] %s2215_s1 }
   0x3   :  { %2224 = sst [smem:[#allocation8_spill]] %s2216_s2 }
   0x4   :  { %2225 = sst [smem:[#allocation9_spill]] %s2217_s3 }
   0x5   :  { %12 = vsyncpa [#allocation4], 0 }
   0x6   :  { %14 = vsyncpa [#allocation4 + $0x1], 0  ;;  %s1644_s21 = smov 0   ;;  %s1646_s22 = smov 0  }
   0x7   :  { %s1648_s23 = smov 0   ;;  %s1650_s24 = smov 0  }
   0x8   :  { %s1652_s25 = smov 0   ;;  %s1654_s26 = smov 0  }
   0x9   :  { %s1656_s27 = smov 0   ;;  %s1658_s28 = smov 0  }
   0xa LB: > { %s1208_s29 = sadd.s32 4294967295, %s1600_s28   ;;  %s1209_s30 = sadd.s32 4294967294, %s1600_s28   ;;  %s1600_s28 = sphi %s1658_s28, %s20_s28   ;;  %s1596_s27 = sphi %s1656_s27, %s2240_s27   ;;  %s1592_s26 = sphi %s1654_s26, %s2239_s26   ;;  %s1588_s25 = sphi %s1652_s25, %s2238_s25   ;;  %s1584_s24 = sphi %s1650_s24, %s2237_s24   ;;  %s1580_s23 = sphi %s1648_s23, %s2236_s23   ;;  %s1576_s22 = sphi %s1646_s22, %s2235_s22   ;;  %s1572_s21 = sphi %s1644_s21, %s2234_s21  }
   0xb   : > { %s29_s7 = sadd.s32 1, %s1592_s26  ;;  %s32_s8 = sadd.s32 1, %s1596_s27 }
   0xc   : > { %p30_p0 = scmp.ge.s32.totalorder %s29_s7, 2  ;;  %p48_p1 = scmp.ne.s32.totalorder %s1580_s23, %s1576_s22 }
   0xd   : > { %p49_p2 = scmp.eq.s32.totalorder %s1600_s28, 0  ;;  %p143_p5 = scmp.eq.s32.totalorder %s1208_s29, 3 }
   0xe   : > { %s2242_s7 = smov (%p30_p0, %s29_s7), 0  ;;  %s2244_s8 = smov (!%p30_p0, %s32_s8), %s1596_s27 }
   0xf   : > { %s37_s9 = ssub.s32 %s1592_s26, %s2242_s7  ;;  %p1696_p3 = por %p49_p2, %p48_p1 }
  0x10   : > { %p34_p4 = scmp.ge.s32.totalorder %s2244_s8, 2  ;;  %p148_p6 = scmp.ne.s32.totalorder %s1576_s22, %s1572_s21 }
  0x11   : > { %p149_p7 = scmp.eq.s32.totalorder %s1209_s30, 3  ;;  %p1704_p8 = por %p143_p5, %p48_p1 }
  0x12   : > { %s2246_s8 = smov (%p34_p4, %s2244_s8), 0  ;;  %s41_s15 = sadd.s32 1, %s1580_s23 }
  0x13   : > { %p1708_p9 = por %p149_p7, %p148_p6  ;;  %s36_s13 = ssub.s32 %s1596_s27, %s2246_s8 }
  0x14   : > { %s38_s14 = sor.u32 %s37_s9, %s36_s13  ;;  %p1211_p11 = scmp.ge.s32.totalorder %s1600_s28, 4 }
  0x15   : > { %p39_p10 = scmp.eq.s32.totalorder %s38_s14, 0 }
  0x16   : > { %230 = sbr.rel (%p1211_p11) target bundleno = 41 (0x29), region = 28 }
  0x17   : > { %s1716_s16 = scalar_select %p39_p10, %s1580_s23, %s41_s15  }
  0x1d   : > { %233 = sbr.rel (!%p1696_p3) target bundleno = 41 (0x29), region = 32  ;;  %s235_s17 = sand.u32 (%p1696_p3), 1, %s1580_s23  }
  0x1e   : > { %s1213_s18 = sshll.u32 (%p1696_p3), %s1596_s27, 3  ;;  %s1212_s19 = sshll.u32 (%p1696_p3), %s235_s17, 5 }
  0x1f   : > { %s239_s20 = sadd.s32 (%p1696_p3), %s1592_s26, %s1213_s18  ;;  %s2229_s0 = sld [smem:[#allocation6_spill]] (%p1696_p3) }
  0x20   : > { %s1214_s29 = sshll.u32 (%p1696_p3), %s239_s20, 3  ;;  %s237_s14 = scalar_lea.vmem (%p1696_p3), [#allocation2], %s1212_s19 }
  0x25   : > { %s241_s13 = scalar_lea.vmem %s2229_s0, %s1214_s29 }
  0x26   : > { %v275_v0 = vld [vmem:[%s241_s13] sm:$0xff]  ;;  %v277_v1 = vld [vmem:[%s241_s13 + $0x10] sm:$0xff] }
  0x27   : > { %v279_v2 = vld [vmem:[%s241_s13 + $0x20] sm:$0xff]  ;;  %276 = vst [vmem:[%s237_s14] sm:$0xff] %v275_v0  ;;  %278 = vst [vmem:[%s237_s14 + $0x8] sm:$0xff] %v277_v1  ;;  %v281_v3 = vld [vmem:[%s241_s13 + $0x30] sm:$0xff] }
  0x28   : > { %280 = vst [vmem:[%s237_s14 + $0x10] sm:$0xff] %v279_v2  ;;  %282 = vst [vmem:[%s237_s14 + $0x18] sm:$0xff] %v281_v3 }
  0x29 PF: > { %p1215_p12 = scmp.ge.s32.totalorder %s1600_s28, 1  ;;  %p287_p13 = scmp.lt.s32.totalorder %s1600_s28, 5 }
  0x2b   : > { %p288_p0 = pnand %p1215_p12, %p287_p13 }
  0x2c   : > { %s2221_s10 = sand.u32 (!%p288_p0), 1, %s1576_s22   ;;  %s2230_s1 = sld [smem:[#allocation7_spill]] (!%p288_p0)  ;;  %vm399_vm0 = vcmask (!%p288_p0), 261120   ;;  %v1602_v5 = vmov (!%p288_p0), 0  }
  0x2d   : > { %291 = sbr.rel (%p288_p0) target bundleno = 750 (0x2ee), region = 70  ;;  %s1735_s18 = sshll.u32 (!%p288_p0), %s2221_s10, 5  ;;  %1505 = vset.pattern.permute.xlu1 (!%p288_p0), %v1602_v5  ;;  %1504 = vset.pattern.permute.xlu0 (!%p288_p0), %v1602_v5 }
  0x2e   : > { %s296_s19 = scalar_lea.vmem (!%p288_p0), [#allocation2], %s1735_s18  ;;  %s2231_s3 = sld [smem:[#allocation9_spill]] (!%p288_p0) }
  0x2f   : > { %v1739_v6 = vld [vmem:[%s296_s19] sm:$0xff] (!%p288_p0)  ;;  %v1741_v7 = vld [vmem:[%s296_s19 + $0x8] sm:$0xff] (!%p288_p0)  ;;  %v1743_v8 = vld [vmem:[%s296_s19 + $0x10] sm:$0xff] (!%p288_p0)  ;;  %s2232_s2 = sld [smem:[#allocation8_spill]] (!%p288_p0)  ;;  %p341_p1 = scmp.lt.s32.totalorder (!%p288_p0), %s1588_s25, 1 }
  0x30   : > { %v1387_v9 = vpack.c.bf16 (!%p288_p0), %v1741_v7, %v1739_v6  ;;  %v1747_v10 = vld [vmem:[%s296_s19 + $0x18] sm:$0xff] (!%p288_p0)  ;;  %p343_p2 = scmp.lt.s32.totalorder (!%p288_p0), %s1584_s24, 1  ;;  %s318_s10 = scalar_lea.vmem (!%p288_p0), [#allocation3], %s1735_s18 }
  0x31   : > { %v1391_v11 = vpack.c.bf16 (!%p288_p0), %v1747_v10, %v1743_v8  ;;  %s1273_s18 = sshll.u32 (!%p288_p0), %s1588_s25, 3  ;;  %s2233_s15 = sand.u32 (!%p288_p0), 1, %s1576_s22  }
  0x32   : > { %v363_v4 = vld [vmem:[%s2230_s1] sm:$0xff] (!%p288_p0)  ;;  %1388 = vmatprep.subr.bf16.mxu0 (!%p288_p0), %v1387_v9  ;;  %v364_v16 = vld [vmem:[%s2230_s1 + $0x8] sm:$0xff] (!%p288_p0)  ;;  %v365_v17 = vld [vmem:[%s2230_s1 + $0x10] sm:$0xff] (!%p288_p0)  ;;  %s1034_s19 = sadd.s32 (!%p288_p0), %s1584_s24, %s1273_s18  ;;  %s2153_s17 = scalar_lea.sflag (!%p288_p0), [#allocation4], %s2233_s15 }
  0x33   : > { %1325 = vmatprep.mubr.msk.f32.mxu0 (!%p288_p0), %vm399_vm0, %v363_v4  ;;  %1390 = vmatpush3.bf16.msra.mxu0 (!%p288_p0), %v1387_v9  ;;  %v366_v20 = vld [vmem:[%s2230_s1 + $0x18] sm:$0xff] (!%p288_p0)  ;;  %v367_v21 = vld [vmem:[%s2230_s1 + $0x20] sm:$0xff] (!%p288_p0)  ;;  %v368_v24 = vld [vmem:[%s2230_s1 + $0x28] sm:$0xff] (!%p288_p0) }
  0x34   : > { %v385_v12 = vld [vmem:[%s2231_s3 + $0x10] sm:$0xff]  ;;  %v383_v13 = vld [vmem:[%s2231_s3] sm:$0xff]  ;;  %1392 = vmatprep.subr.bf16.mxu0 %v1391_v11  ;;  %v386_v14 = vld [vmem:[%s2231_s3 + $0x18] sm:$0xff]  ;;  %s2093_s20 = scalar_select %p341_p1, %s1588_s25, 1 }
  0x35   : > { %605 = vperm.xlu1 %1505, %v385_v12   ;;  %595 = vperm.xlu0 %1504, %v383_v13   ;;  %v384_v15 = vld [vmem:[%s2231_s3 + $0x8] sm:$0xff]  ;;  %v387_v19 = vld [vmem:[%s2231_s3 + $0x20] sm:$0xff]  ;;  %v390_v22 = vld [vmem:[%s2231_s3 + $0x38] sm:$0xff]  ;;  %s2096_s29 = scalar_select %p343_p2, %s1584_s24, 1 }
  0x36   : > { %v388_v18 = vld [vmem:[%s2231_s3 + $0x28] sm:$0xff]  ;;  %v389_v23 = vld [vmem:[%s2231_s3 + $0x30] sm:$0xff]  ;;  %v391_v27 = vld [vmem:[%s2231_s3 + $0x40] sm:$0xff]  ;;  %s1219_s9 = sshll.u32 %s2093_s20, 5 }
  0x37   : > { %1394 = vmatpush3.bf16.msra.mxu0 %v1391_v11  ;;  %v369_v25 = vld [vmem:[%s2230_s1 + $0x30] sm:$0xff]  ;;  %v392_v26 = vld [vmem:[%s2231_s3 + $0x48] sm:$0xff]  ;;  %v370_v28 = vld [vmem:[%s2230_s1 + $0x38] sm:$0xff]  ;;  %s1218_s30 = sshll.u32 %s2096_s29, 4 }
  0x38   : > { %v371_v29 = vld [vmem:[%s2230_s1 + $0x40] sm:$0xff]  ;;  %v394_v30 = vld [vmem:[%s2231_s3 + $0x58] sm:$0xff]  ;;  %v393_v31 = vld [vmem:[%s2231_s3 + $0x50] sm:$0xff]  ;;  %s347_s13 = sadd.s32 %s1219_s9, %s1218_s30  ;;  %s1274_s30 = sshll.u32 %s1034_s19, 7 }
  0x39   : > { %610 = vperm.xlu1 %1505, %v386_v14   ;;  %600 = vperm.xlu0 %1504, %v384_v15   ;;  %v372_v32 = vld [vmem:[%s2230_s1 + $0x48] sm:$0xff]  ;;  %v373_v33 = vld [vmem:[%s2230_s1 + $0x50] sm:$0xff]  ;;  %v395_v35 = vld [vmem:[%s2231_s3 + $0x60] sm:$0xff]  ;;  %s1220_s14 = sshll.u32 %s347_s13, 3 }
  0x3a   : > { %1326 = vmatmul.mubr.msk.f32.vlgmr.msra.gmra.mrb[0].mxu0 %vm399_vm0, %v364_v16  ;;  %v396_v34 = vld [vmem:[%s2231_s3 + $0x68] sm:$0xff]  ;;  %v374_v36 = vld [vmem:[%s2230_s1 + $0x58] sm:$0xff]  ;;  %v375_v37 = vld [vmem:[%s2230_s1 + $0x60] sm:$0xff]  ;;  %s2103_s0 = scalar_lea.vmem %s2219_s5, %s1220_s14  ;;  %s2149_s14 = scalar_lea.hbm %s2218_s4, %s1274_s30 }
  0x3b   : > { %1328 = vmatprep.mubr.msk.f32.mxu0 %vm399_vm0, %v365_v17  ;;  %v398_v38 = vld [vmem:[%s2231_s3 + $0x78] sm:$0xff]  ;;  %v397_v39 = vld [vmem:[%s2231_s3 + $0x70] sm:$0xff]  ;;  %v376_v40 = vld [vmem:[%s2230_s1 + $0x68] sm:$0xff] }
  0x3c   : > { %v377_v41 = vld [vmem:[%s2230_s1 + $0x70] sm:$0xff]  ;;  %v378_v42 = vld [vmem:[%s2230_s1 + $0x78] sm:$0xff]  ;;  %v379_v44 = vld [vmem:[%s2232_s2] sm:$0xff] }
  0x3d   : > { %620 = vperm.xlu1 %1505, %v388_v18   ;;  %615 = vperm.xlu0 %1504, %v387_v19  }
  0x3e   : > { %1329 = vmatmul.mubr.msk.f32.gmra.mrb[2].mxu0 %vm399_vm0, %v366_v20  ;;  %1381 = vmatprep.mubr.f32.mxu1 %v379_v44 }
  0x3f   : > { %1331 = vmatprep.mubr.msk.f32.mxu0 %vm399_vm0, %v367_v21 }
  0x41   : > { %630 = vperm.xlu1 %1505, %v390_v22   ;;  %625 = vperm.xlu0 %1504, %v389_v23  }
  0x42   : > { %1332 = vmatmul.mubr.msk.f32.gmra.mrb[4].mxu0 %vm399_vm0, %v368_v24 }
  0x43   : > { %1334 = vmatprep.mubr.msk.f32.mxu0 %vm399_vm0, %v369_v25 }
  0x45   : > { %640 = vperm.xlu1 %1505, %v392_v26   ;;  %635 = vperm.xlu0 %1504, %v391_v27  }
  0x46   : > { %1335 = vmatmul.mubr.msk.f32.gmra.mrb[6].mxu0 %vm399_vm0, %v370_v28 }
  0x47   : > { %1337 = vmatprep.mubr.msk.f32.mxu0 %vm399_vm0, %v371_v29 }
  0x49   : > { %650 = vperm.xlu1 %1505, %v394_v30   ;;  %645 = vperm.xlu0 %1504, %v393_v31  }
  0x4a   : > { %1338 = vmatmul.mubr.msk.f32.gmra.mrb[8].mxu0 %vm399_vm0, %v372_v32 }
  0x4b   : > { %1340 = vmatprep.mubr.msk.f32.mxu0 %vm399_vm0, %v373_v33 }
  0x4d   : > { %660 = vperm.xlu1 %1505, %v396_v34   ;;  %655 = vperm.xlu0 %1504, %v395_v35  }
  0x4e   : > { %1341 = vmatmul.mubr.msk.f32.gmra.mrb[10].mxu0 %vm399_vm0, %v374_v36 }
  0x4f   : > { %1343 = vmatprep.mubr.msk.f32.mxu0 %vm399_vm0, %v375_v37 }
  0x51   : > { %670 = vperm.xlu1 %1505, %v398_v38   ;;  %665 = vperm.xlu0 %1504, %v397_v39  }
  0x52   : > { %1344 = vmatmul.mubr.msk.f32.gmra.mrb[12].mxu0 %vm399_vm0, %v376_v40 }
  0x53   : > { %1346 = vmatprep.mubr.msk.f32.mxu0 %vm399_vm0, %v377_v41 }
  0x56   : > { %1347 = vmatmul.mubr.msk.f32.gmra.mrb[14].mxu0 %vm399_vm0, %v378_v42 }
  0xb4   : > { %v606_v43 = vpop.permute.xlu1 %605  ;;  %v596_v45 = vpop.permute.xlu0 %595 }
  0xb8   : > { %v611_v46 = vpop.permute.xlu1 %610  ;;  %v601_v47 = vpop.permute.xlu0 %600 }
  0xbc   : > { %v621_v48 = vpop.permute.xlu1 %620  ;;  %v616_v49 = vpop.permute.xlu0 %615 }
  0xc0   : > { %v631_v52 = vpop.permute.xlu1 %630  ;;  %v626_v54 = vpop.permute.xlu0 %625 }
  0xc4   : > { %v641_v60 = vpop.permute.xlu1 %640  ;;  %v636_v63 = vpop.permute.xlu0 %635 }
  0xc8   : > { %v651_v13 = vpop.permute.xlu1 %650  ;;  %v646_v16 = vpop.permute.xlu0 %645 }
  0xcc   : > { %v661_v25 = vpop.permute.xlu1 %660  ;;  %v656_v27 = vpop.permute.xlu0 %655 }
  0xd0   : > { %v671_v35 = vpop.permute.xlu1 %670  ;;  %v666_v38 = vpop.permute.xlu0 %665 }
 0x10d   : > { %v1327_v50 = vpop.f32.mrb[0].mxu0 }
 0x10e   : > { %v514_v51 = vpop.f32.mrb[1].mxu0  ;;  %v1862_v57 = vadd.f32 %v1327_v50, %v601_v47  ;;  %v689_v47 = vlaneseq }
 0x10f   : > { %v1866_v61 = vadd.f32 %v596_v45, %v514_v51 }
 0x110   : > { %v1898_v50 = vshrl.u32 %v689_v47, 7  ;;  %v1603_v47 = vmov 0.0  }
 0x111   : > { %v1330_v53 = vpop.f32.mrb[2].mxu0 }
 0x112   : > { %v524_v55 = vpop.f32.mrb[3].mxu0  ;;  %v1874_v3 = vadd.f32 %v1330_v53, %v611_v46  ;;  %v1901_v53 = vadd.s32 16, %v1898_v50 }
 0x113   : > { %v1878_v9 = vadd.f32 %v606_v43, %v524_v55 }
 0x115   : > { %v1333_v56 = vpop.f32.mrb[4].mxu0 }
 0x116   : > { %v1864_v58 = vadd.f32 %v1333_v56, %v621_v48  ;;  %v534_v59 = vpop.f32.mrb[5].mxu0  ;;  %v1907_v56 = vadd.s32 48, %v1898_v50 }
 0x117   : > { %v1868_v62 = vadd.f32 %v616_v49, %v534_v59  ;;  %v1910_v59 = vadd.s32 56, %v1898_v50 }
 0x118   : > { %v707_v0 = vmin.f32 %v1862_v57, %v1864_v58 }
 0x119   : > { %v706_v1 = vmin.f32 %v1866_v61, %v1868_v62  ;;  %v1336_v2 = vpop.f32.mrb[6].mxu0 }
 0x11a   : > { %v1876_v4 = vadd.f32 %v1336_v2, %v631_v52  ;;  %v544_v5 = vpop.f32.mrb[7].mxu0 }
 0x11b   : > { %v1880_v11 = vadd.f32 %v626_v54, %v544_v5  ;;  %v1904_v54 = vadd.s32 24, %v1898_v50  ;;  %v1925_v5 = vadd.s32 8, %v1898_v50 }
 0x11c   : > { %v709_v12 = vmin.f32 %v1874_v3, %v1876_v4 }
 0x11d   : > { %v708_v14 = vmin.f32 %v1878_v9, %v1880_v11  ;;  %v1339_v15 = vpop.f32.mrb[8].mxu0 }
 0x11e   : > { %v1886_v17 = vadd.f32 %v1339_v15, %v641_v60  ;;  %v554_v18 = vpop.f32.mrb[9].mxu0  ;;  %v1913_v60 = vadd.s32 80, %v1898_v50  ;;  %v1937_v15 = vadd.s32 72, %v1898_v50 }
 0x11f   : > { %v1888_v19 = vadd.f32 %v636_v63, %v554_v18  ;;  %v1916_v63 = vadd.s32 88, %v1898_v50 }
 0x120   : > { %v711_v20 = vmin.f32 %v707_v0, %v1886_v17  ;;  %v1919_v0 = vadd.s32 112, %v1898_v50 }
 0x121   : > { %v710_v21 = vmin.f32 %v706_v1, %v1888_v19  ;;  %v1342_v22 = vpop.f32.mrb[10].mxu0  ;;  %v1922_v1 = vadd.s32 120, %v1898_v50 }
 0x122   : > { %v684_v23 = vadd.f32 %v1342_v22, %v651_v13  ;;  %v564_v24 = vpop.f32.mrb[11].mxu0  ;;  %v1931_v13 = vadd.s32 40, %v1898_v50 }
 0x123   : > { %v683_v26 = vadd.f32 %v646_v16, %v564_v24 }
 0x124   : > { %v713_v28 = vmin.f32 %v709_v12, %v684_v23  ;;  %v1928_v12 = vadd.s32 32, %v1898_v50 }
 0x125   : > { %v712_v29 = vmin.f32 %v708_v14, %v683_v26  ;;  %v1345_v30 = vpop.f32.mrb[12].mxu0  ;;  %v1934_v14 = vadd.s32 64, %v1898_v50 }
 0x126   : > { %v1892_v31 = vadd.f32 %v1345_v30, %v661_v25  ;;  %v574_v32 = vpop.f32.mrb[13].mxu0 }
 0x127   : > { %v1894_v33 = vadd.f32 %v656_v27, %v574_v32 }
 0x128   : > { %v715_v34 = vmin.f32 %v711_v20, %v1892_v31 }
 0x129   : > { %v714_v36 = vmin.f32 %v710_v21, %v1894_v33  ;;  %v1348_v37 = vpop.f32.mrb[14].mxu0 }
 0x12a   : > { %v688_v39 = vadd.f32 %v1348_v37, %v671_v35  ;;  %v584_v40 = vpop.f32.mrb[15].mxu0 }
 0x12b   : > { %v718_v41 = vmin.f32 %v714_v36, %v715_v34  ;;  %v687_v42 = vadd.f32 %v666_v38, %v584_v40  ;;  %v1972_v34 = vadd.s32 96, %v1898_v50 }
 0x12c   : > { %v717_v43 = vmin.f32 %v713_v28, %v688_v39 }
 0x12d   : > { %v716_v44 = vmin.f32 %v712_v29, %v687_v42 }
 0x12f   : > { %v719_v45 = vmin.f32 %v716_v44, %v717_v43 }
 0x131   : > { %v720_v46 = vmin.f32 %v718_v41, %v719_v45 }
 0x133   : > { %v721_v48 = vrot.slane %v720_v46, 4 }
 0x135   : > { %v722_v49 = vmin.f32 %v720_v46, %v721_v48 }
 0x137   : > { %v723_v51 = vrot.slane %v722_v49, 2 }
 0x139   : > { %v724_v52 = vmin.f32 %v722_v49, %v723_v51  ;;  %v1604_v51 = vmov 1.0|1.0  }
 0x13b   : > { %v725_v55 = vrot.slane %v724_v52, 1 }
 0x13d   : > { %v726_v2 = vmin.f32 %v724_v52, %v725_v55 }
 0x13f   : > { %vm729_vm1 = vcmp.eq.f32.partialorder %v1878_v9, %v726_v2  ;;  %vm730_vm2 = vcmp.eq.f32.partialorder %v1874_v3, %v726_v2  ;;  %vm733_vm3 = vcmp.eq.f32.partialorder %v1880_v11, %v726_v2  ;;  %vm734_vm4 = vcmp.eq.f32.partialorder %v1876_v4, %v726_v2 }
 0x140   : > { %vm737_vm5 = vcmp.eq.f32.partialorder %v683_v26, %v726_v2  ;;  %vm738_vm6 = vcmp.eq.f32.partialorder %v684_v23, %v726_v2  ;;  %vm741_vm7 = vcmp.eq.f32.partialorder %v687_v42, %v726_v2  ;;  %vm742_vm8 = vcmp.eq.f32.partialorder %v688_v39, %v726_v2 }
 0x141   : > { %v745_v16 = vsel %vm729_vm1, %v1901_v53, 128  ;;  %v746_v18 = vsel %vm730_vm2, %v1904_v54, 128  ;;  %v749_v20 = vsel %vm733_vm3, %v1907_v56, 128  ;;  %v750_v21 = vsel %vm734_vm4, %v1910_v59, 128 }
 0x142   : > { %v753_v9 = vsel %vm737_vm5, %v1913_v60, 128  ;;  %v754_v3 = vsel %vm738_vm6, %v1916_v63, 128  ;;  %v757_v11 = vsel %vm741_vm7, %v1919_v0, 128  ;;  %v758_v4 = vsel %vm742_vm8, %v1922_v1, 128 }
 0x143   : > { %vm763_vm9 = vcmp.lt.s32.totalorder %v745_v16, %v749_v20  ;;  %vm765_vm10 = vcmp.lt.s32.totalorder %v746_v18, %v750_v21  ;;  %vm727_vm11 = vcmp.eq.f32.partialorder %v1866_v61, %v726_v2  ;;  %vm728_vm12 = vcmp.eq.f32.partialorder %v1862_v57, %v726_v2 }
 0x144   : > { %v764_v22 = vsel %vm763_vm9, %v745_v16, %v749_v20  ;;  %v766_v23 = vsel %vm765_vm10, %v746_v18, %v750_v21  ;;  %vm731_vm13 = vcmp.eq.f32.partialorder %v1868_v62, %v726_v2  ;;  %vm732_vm14 = vcmp.eq.f32.partialorder %v1864_v58, %v726_v2 }
 0x145   : > { %vm771_vm15 = vcmp.lt.s32.totalorder %v764_v22, %v753_v9  ;;  %vm773_vm0 = vcmp.lt.s32.totalorder %v766_v23, %v754_v3  ;;  %vm735_vm1 = vcmp.eq.f32.partialorder %v1888_v19, %v726_v2  ;;  %vm736_vm2 = vcmp.eq.f32.partialorder %v1886_v17, %v726_v2 }
 0x146   : > { %v772_v24 = vsel %vm771_vm15, %v764_v22, %v753_v9  ;;  %v774_v25 = vsel %vm773_vm0, %v766_v23, %v754_v3  ;;  %vm739_vm3 = vcmp.eq.f32.partialorder %v1894_v33, %v726_v2  ;;  %vm740_vm4 = vcmp.eq.f32.partialorder %v1892_v31, %v726_v2 }
 0x147   : > { %vm779_vm5 = vcmp.lt.s32.totalorder %v772_v24, %v757_v11  ;;  %vm781_vm6 = vcmp.lt.s32.totalorder %v774_v25, %v758_v4  ;;  %v743_v26 = vsel %vm727_vm11, %v1898_v50, 128  ;;  %v744_v27 = vsel %vm728_vm12, %v1925_v5, 128 }
 0x148   : > { %v780_v28 = vsel %vm779_vm5, %v772_v24, %v757_v11  ;;  %v782_v29 = vsel %vm781_vm6, %v774_v25, %v758_v4  ;;  %v747_v30 = vsel %vm731_vm13, %v1928_v12, 128  ;;  %v748_v32 = vsel %vm732_vm14, %v1931_v13, 128 }
 0x149   : > { %vm785_vm7 = vcmp.lt.s32.totalorder %v780_v28, %v782_v29  ;;  %v1975_v61 = vadd.s32 104, %v1898_v50  ;;  %vm759_vm8 = vcmp.lt.s32.totalorder %v743_v26, %v747_v30  ;;  %vm761_vm9 = vcmp.lt.s32.totalorder %v744_v27, %v748_v32 }
 0x14a   : > { %v786_v35 = vsel %vm785_vm7, %v780_v28, %v782_v29  ;;  %v751_v57 = vsel %vm735_vm1, %v1934_v14, 128  ;;  %v752_v62 = vsel %vm736_vm2, %v1937_v15, 128  ;;  %v760_v58 = vsel %vm759_vm8, %v743_v26, %v747_v30 }
 0x14b   : > { %v762_v36 = vsel %vm761_vm9, %v744_v27, %v748_v32  ;;  %vm767_vm10 = vcmp.lt.s32.totalorder %v760_v58, %v751_v57  ;;  %v755_v37 = vsel %vm739_vm3, %v1972_v34, 128  ;;  %v756_v38 = vsel %vm740_vm4, %v1975_v61, 128 }
 0x14c   : > { %vm769_vm11 = vcmp.lt.s32.totalorder %v762_v36, %v752_v62  ;;  %v768_v39 = vsel %vm767_vm10, %v760_v58, %v751_v57 }
 0x14d   : > { %v770_v40 = vsel %vm769_vm11, %v762_v36, %v752_v62  ;;  %vm775_vm12 = vcmp.lt.s32.totalorder %v768_v39, %v755_v37 }
 0x14e   : > { %vm777_vm13 = vcmp.lt.s32.totalorder %v770_v40, %v756_v38  ;;  %v776_v19 = vsel %vm775_vm12, %v768_v39, %v755_v37 }
 0x14f   : > { %v778_v41 = vsel %vm777_vm13, %v770_v40, %v756_v38 }
 0x150   : > { %vm783_vm14 = vcmp.lt.s32.totalorder %v776_v19, %v778_v41 }
 0x151   : > { %v784_v17 = vsel %vm783_vm14, %v776_v19, %v778_v41 }
 0x152   : > { %vm787_vm15 = vcmp.lt.s32.totalorder %v784_v17, %v786_v35 }
 0x153   : > { %v788_v42 = vsel %vm787_vm15, %v784_v17, %v786_v35 }
 0x154   : > { %v789_v43 = vrot.slane %v788_v42, 4 }
 0x156   : > { %vm790_vm0 = vcmp.lt.s32.totalorder %v788_v42, %v789_v43 }
 0x157   : > { %v791_v44 = vsel %vm790_vm0, %v788_v42, %v789_v43 }
 0x158   : > { %v792_v45 = vrot.slane %v791_v44, 2 }
 0x15a   : > { %vm793_vm1 = vcmp.lt.s32.totalorder %v791_v44, %v792_v45 }
 0x15b   : > { %v794_v33 = vsel %vm793_vm1, %v791_v44, %v792_v45 }
 0x15c   : > { %v795_v46 = vrot.slane %v794_v33, 1 }
 0x15e   : > { %vm796_vm2 = vcmp.lt.s32.totalorder %v794_v33, %v795_v46 }
 0x15f   : > { %v1989_v31 = vsel %vm796_vm2, %v794_v33, %v795_v46 }
 0x160   : > { %vm799_vm3 = vcmp.eq.s32.totalorder %v1925_v5, %v1989_v31  ;;  %vm798_vm4 = vcmp.eq.s32.totalorder %v1898_v50, %v1989_v31  ;;  %vm800_vm5 = vcmp.eq.s32.totalorder %v1901_v53, %v1989_v31  ;;  %vm801_vm6 = vcmp.eq.s32.totalorder %v1904_v54, %v1989_v31 }
 0x161   : > { %v1241_v48 = vsel %vm799_vm3, 1.0, %v1603_v47  ;;  %vm1395_vm7 = vmpackc.low %vm799_vm3, %vm798_vm4  ;;  %v1240_v49 = vsel %vm798_vm4, 1.0, %v1603_v47  ;;  %vm802_vm8 = vcmp.eq.s32.totalorder %v1928_v12, %v1989_v31  ;;  %vm803_vm10 = vcmp.eq.s32.totalorder %v1931_v13, %v1989_v31 }
 0x162   : > { %941 = vadd.xlane.f32.xlu1 %v1241_v48  ;;  %1396 = vmatprep.subr.msk.bf16.mxu1 %vm1395_vm7, %v1604_v51  ;;  %vm1399_vm9 = vmpackc.low %vm801_vm6, %vm800_vm5  ;;  %v1244_v50 = vsel %vm802_vm8, 1.0, %v1603_v47  ;;  %v1242_v52 = vsel %vm800_vm5, 1.0, %v1603_v47  ;;  %vm804_vm11 = vcmp.eq.s32.totalorder %v1907_v56, %v1989_v31  ;;  %vm805_vm13 = vcmp.eq.s32.totalorder %v1910_v59, %v1989_v31 }
 0x163   : > { %939 = vadd.xlane.f32.xlu0 %v1240_v49  ;;  %1398 = vmatpush3.bf16.msk.msra.mxu1 %vm1395_vm7, %v1604_v51  ;;  %vm1403_vm12 = vmpackc.low %vm803_vm10, %vm802_vm8  ;;  %v1246_v55 = vsel %vm804_vm11, 1.0, %v1603_v47  ;;  %v1243_v53 = vsel %vm801_vm6, 1.0, %v1603_v47  ;;  %vm806_vm14 = vcmp.eq.s32.totalorder %v1934_v14, %v1989_v31  ;;  %vm807_vm0 = vcmp.eq.s32.totalorder %v1937_v15, %v1989_v31  ;;  %v382_v15 = vld [vmem:[%s2232_s2 + $0x18] sm:$0xff] }
 0x164   : > { %1400 = vmatprep.subr.msk.bf16.mxu1 %vm1399_vm9, %v1604_v51  ;;  %vm1407_vm15 = vmpackc.low %vm805_vm13, %vm804_vm11  ;;  %v1248_v56 = vsel %vm806_vm14, 1.0, %v1603_v47  ;;  %v1245_v54 = vsel %vm803_vm10, 1.0, %v1603_v47  ;;  %vm808_vm1 = vcmp.eq.s32.totalorder %v1913_v60, %v1989_v31  ;;  %vm809_vm3 = vcmp.eq.s32.totalorder %v1916_v63, %v1989_v31  ;;  %v380_v63 = vld [vmem:[%s2232_s2 + $0x8] sm:$0xff] }
 0x165   : > { %vm1411_vm2 = vmpackc.low %vm807_vm0, %vm806_vm14  ;;  %v1250_v2 = vsel %vm808_vm1, 1.0, %v1603_v47  ;;  %v1247_v5 = vsel %vm805_vm13, 1.0, %v1603_v47  ;;  %vm810_vm4 = vcmp.eq.s32.totalorder %v1972_v34, %v1989_v31  ;;  %vm811_vm6 = vcmp.eq.s32.totalorder %v1975_v61, %v1989_v31 }
 0x166   : > { %947 = vadd.xlane.f32.xlu1 %v1244_v50  ;;  %vm1415_vm5 = vmpackc.low %vm809_vm3, %vm808_vm1  ;;  %v1252_v60 = vsel %vm810_vm4, 1.0, %v1603_v47  ;;  %v1249_v59 = vsel %vm807_vm0, 1.0, %v1603_v47  ;;  %vm812_vm7 = vcmp.eq.s32.totalorder %v1919_v0, %v1989_v31  ;;  %v1251_v13 = vsel %vm809_vm3, 1.0, %v1603_v47 }
 0x167   : > { %943 = vadd.xlane.f32.xlu0 %v1242_v52  ;;  %1402 = vmatpush3.bf16.msk.msra.mxu1 %vm1399_vm9, %v1604_v51  ;;  %vm1419_vm8 = vmpackc.low %vm811_vm6, %vm810_vm4  ;;  %vm813_vm9 = vcmp.eq.s32.totalorder %v1922_v1, %v1989_v31  ;;  %v1254_v12 = vsel %vm812_vm7, 1.0, %v1603_v47  ;;  %v1253_v0 = vsel %vm811_vm6, 1.0, %v1603_v47  ;;  %v381_v1 = vld [vmem:[%s2232_s2 + $0x10] sm:$0xff]  ;;  %vm971_vm11 = vcmask 7168  }
 0x168   : > { %1404 = vmatprep.subr.msk.bf16.mxu1 %vm1403_vm12, %v1604_v51  ;;  %vm1423_vm10 = vmpackc.low %vm813_vm9, %vm812_vm7  ;;  %v1255_v14 = vsel %vm813_vm9, 1.0, %v1603_v47 }
 0x16a   : > { %951 = vadd.xlane.f32.xlu1 %v1246_v55 }
 0x16b   : > { %945 = vadd.xlane.f32.xlu0 %v1243_v53  ;;  %1406 = vmatpush3.bf16.msk.msra.mxu1 %vm1403_vm12, %v1604_v51 }
 0x16c   : > { %1408 = vmatprep.subr.msk.bf16.mxu1 %vm1407_vm15, %v1604_v51 }
 0x16e   : > { %955 = vadd.xlane.f32.xlu1 %v1248_v56 }
 0x16f   : > { %949 = vadd.xlane.f32.xlu0 %v1245_v54  ;;  %1410 = vmatpush3.bf16.msk.msra.mxu1 %vm1407_vm15, %v1604_v51 }
 0x170   : > { %1412 = vmatprep.subr.msk.bf16.mxu1 %vm1411_vm2, %v1604_v51 }
 0x172   : > { %959 = vadd.xlane.f32.xlu1 %v1250_v2 }
 0x173   : > { %953 = vadd.xlane.f32.xlu0 %v1247_v5  ;;  %1414 = vmatpush3.bf16.msk.msra.mxu1 %vm1411_vm2, %v1604_v51 }
 0x174   : > { %1416 = vmatprep.subr.msk.bf16.mxu1 %vm1415_vm5, %v1604_v51 }
 0x176   : > { %963 = vadd.xlane.f32.xlu1 %v1252_v60 }
 0x177   : > { %957 = vadd.xlane.f32.xlu0 %v1249_v59  ;;  %1418 = vmatpush3.bf16.msk.msra.mxu1 %vm1415_vm5, %v1604_v51 }
 0x178   : > { %1420 = vmatprep.subr.msk.bf16.mxu1 %vm1419_vm8, %v1604_v51 }
 0x17a   : > { %967 = vadd.xlane.f32.xlu1 %v1254_v12 }
 0x17b   : > { %961 = vadd.xlane.f32.xlu0 %v1251_v13  ;;  %1422 = vmatpush3.bf16.msk.msra.mxu1 %vm1419_vm8, %v1604_v51 }
 0x17c   : > { %1424 = vmatprep.subr.msk.bf16.mxu1 %vm1423_vm10, %v1604_v51 }
 0x17f   : > { %965 = vadd.xlane.f32.xlu0 %v1253_v0  ;;  %1426 = vmatpush3.bf16.msk.msra.mxu1 %vm1423_vm10, %v1604_v51 }
 0x182   : > { %1382 = vmatmul.mubr.f32.vlgmr.msra.gmra.mrb[0].mxu1 %v380_v63 }
 0x183   : > { %969 = vadd.xlane.f32.xlu0 %v1255_v14  ;;  %1384 = vmatprep.mubr.f32.mxu1 %v381_v1 }
 0x186   : > { %1385 = vmatmul.mubr.f32.gmra.mrb[2].mxu1 %v382_v15 }
 0x1ef   : > { %v942_v16 = vpop.xlane.xlu1 %941 }
 0x1f0   : > { %973 = vst.msk [vmem:[%s2103_s0 + $0x8] sm:$0xff] %vm971_vm11, %v942_v16  ;;  %v940_v18 = vpop.xlane.xlu0 %939 }
 0x1f1   : > { %972 = vst.msk [vmem:[%s2103_s0] sm:$0xff] %vm971_vm11, %v940_v18 }
 0x1f3   : > { %v948_v20 = vpop.xlane.xlu1 %947 }
 0x1f4   : > { %976 = vst.msk [vmem:[%s2103_s0 + $0x20] sm:$0xff] %vm971_vm11, %v948_v20  ;;  %v944_v21 = vpop.xlane.xlu0 %943 }
 0x1f5   : > { %974 = vst.msk [vmem:[%s2103_s0 + $0x10] sm:$0xff] %vm971_vm11, %v944_v21 }
 0x1f7   : > { %v952_v9 = vpop.xlane.xlu1 %951 }
 0x1f8   : > { %978 = vst.msk [vmem:[%s2103_s0 + $0x30] sm:$0xff] %vm971_vm11, %v952_v9  ;;  %v946_v3 = vpop.xlane.xlu0 %945 }
 0x1f9   : > { %975 = vst.msk [vmem:[%s2103_s0 + $0x18] sm:$0xff] %vm971_vm11, %v946_v3 }
 0x1fb   : > { %v956_v11 = vpop.xlane.xlu1 %955 }
 0x1fc   : > { %980 = vst.msk [vmem:[%s2103_s0 + $0x40] sm:$0xff] %vm971_vm11, %v956_v11  ;;  %v950_v4 = vpop.xlane.xlu0 %949 }
 0x1fd   : > { %977 = vst.msk [vmem:[%s2103_s0 + $0x28] sm:$0xff] %vm971_vm11, %v950_v4 }
 0x1ff   : > { %v960_v22 = vpop.xlane.xlu1 %959 }
 0x200   : > { %982 = vst.msk [vmem:[%s2103_s0 + $0x50] sm:$0xff] %vm971_vm11, %v960_v22  ;;  %v954_v23 = vpop.xlane.xlu0 %953 }
 0x201   : > { %979 = vst.msk [vmem:[%s2103_s0 + $0x38] sm:$0xff] %vm971_vm11, %v954_v23 }
 0x203   : > { %v964_v24 = vpop.xlane.xlu1 %963 }
 0x204   : > { %984 = vst.msk [vmem:[%s2103_s0 + $0x60] sm:$0xff] %vm971_vm11, %v964_v24  ;;  %v958_v25 = vpop.xlane.xlu0 %957 }
 0x205   : > { %981 = vst.msk [vmem:[%s2103_s0 + $0x48] sm:$0xff] %vm971_vm11, %v958_v25 }
 0x207   : > { %v968_v26 = vpop.xlane.xlu1 %967 }
 0x208   : > { %986 = vst.msk [vmem:[%s2103_s0 + $0x70] sm:$0xff] %vm971_vm11, %v968_v26  ;;  %v962_v27 = vpop.xlane.xlu0 %961 }
 0x209   : > { %983 = vst.msk [vmem:[%s2103_s0 + $0x58] sm:$0xff] %vm971_vm11, %v962_v27 }
 0x20c   : > { %v966_v28 = vpop.xlane.xlu0 %965 }
 0x20d   : > { %985 = vst.msk [vmem:[%s2103_s0 + $0x68] sm:$0xff] %vm971_vm11, %v966_v28 }
 0x210   : > { %v970_v29 = vpop.xlane.xlu0 %969 }
 0x211   : > { %987 = vst.msk [vmem:[%s2103_s0 + $0x78] sm:$0xff] %vm971_vm11, %v970_v29  ;;  %s1037_s0 = sshll.u32 %s318_s10, 4  ;;  %s2142_s0 = int_to_ptr.vmem [resolvable:$true] %s1037_s0 }
 0x212   : > { %s1506_s1 = scalar_lea.vmem %s2142_s0, 512 }
 0x213   : > { %p1507_p3 = scmp.ne.s32.totalorder %s2142_s0, %s1506_s1 }
 0x215   : > { %p1508_p4 = pnand %p1507_p3, %p1704_p8 }
 0x217   : > { %p1509_p5 = pneg %p1508_p4 }
 0x255   : > { %v1383_v30 = vpop.f32.mrb[0].mxu1 }
 0x256   : > { %932 = vst [vmem:[%s318_s10 + $0x8] sm:$0xff] %v1383_v30  ;;  %v936_v32 = vsub.f32 %v1383_v30, %v1741_v7  ;;  %v912_v34 = vpop.f32.mrb[1].mxu1 }
 0x257   : > { %931 = vst [vmem:[%s318_s10] sm:$0xff] %v912_v34  ;;  %v935_v61 = vsub.f32 %v912_v34, %v1739_v6 }
 0x258   : > { %v989_v35 = vmul.f32 %v936_v32, %v936_v32 }
 0x259   : > { %v1386_v57 = vpop.f32.mrb[2].mxu1  ;;  %v988_v62 = vmul.f32 %v935_v61, %v935_v61 }
 0x25a   : > { %934 = vst [vmem:[%s318_s10 + $0x18] sm:$0xff] %v1386_v57  ;;  %v938_v58 = vsub.f32 %v1386_v57, %v1747_v10  ;;  %v922_v36 = vpop.f32.mrb[3].mxu1  ;;  %994 = vadd.xlane.f32.xlu0 %v989_v35 }
 0x25b   : > { %933 = vst [vmem:[%s318_s10 + $0x10] sm:$0xff] %v922_v36  ;;  %v937_v37 = vsub.f32 %v922_v36, %v1743_v8  ;;  %992 = vadd.xlane.f32.xlu1 %v988_v62  ;;  %s1605_s10 = smov [#allocation3]  }
 0x25c   : > { %v991_v7 = vmul.f32 %v938_v58, %v938_v58  ;;  %s1510_s2 = sshll.u32 %s1605_s10, 4  ;;  %s1511_s2 = int_to_ptr.vmem [resolvable:$false] %s1510_s2 }
 0x25d   : > { %v990_v38 = vmul.f32 %v937_v37, %v937_v37  ;;  %s1512_s3 = scalar_lea.vmem %s1511_s2, 1024  ;;  %p1513_p6 = scmp.lt.s32.totalorder %s2142_s0, %s1511_s2 }
 0x25e   : > { %998 = vadd.xlane.f32.xlu0 %v991_v7  ;;  %p1514_p7 = scmp.lt.s32.totalorder %s1512_s3, %s1506_s1 }
 0x25f   : > { %996 = vadd.xlane.f32.xlu1 %v990_v38 }
 0x260   : > { %p1515_p10 = por %p1514_p7, %p1513_p6 }
 0x262   : > { %p1516_p11 = pnand %p1515_p10, %p1509_p5 }
 0x264   : > { %1519 = shalt.err (!%p1516_p11)
}
 0x265   : > { %s1520_s24 = scalar_lea.hbm %s2149_s14, 512  ;;  %s1524_s19 = scalar_lea.hbm %s2218_s4, 2048 }
 0x266   : > { %p1521_p12 = scmp.ne.s32.totalorder %s2149_s14, %s1520_s24  ;;  %p1525_p1 = scmp.lt.u32.totalorder %s2149_s14, %s2218_s4 }
 0x267   : > { %p1526_p2 = scmp.lt.u32.totalorder %s1524_s19, %s1520_s24  ;;  %p1528_p4 = scmp.lt.u32.totalorder %s1520_s24, %s2149_s14 }
 0x268   : > { %p1522_p13 = pnand %p1521_p12, %p1704_p8 }
 0x269   : > { %p1527_p3 = por %p1526_p2, %p1525_p1 }
 0x26a   : > { %p1523_p0 = pneg %p1522_p13 }
 0x26b   : > { %p1529_p5 = por %p1528_p4, %p1527_p3 }
 0x26d   : > { %p1530_p6 = pnand %p1529_p5, %p1523_p0 }
 0x26f   : > { %1533 = shalt.err (!%p1530_p6)
}
 0x270   : > { %s1606_s1 = smov 128   ;;  %s1607_s3 = smov 256  }
 0x271   : > { %s1608_s9 = smov 8   ;;  %s1221_s13 = sshll.u32 %s2096_s29, 2 }
 0x272   : > { %1427 = dma.vmem_to_hbm [thread:$0]  (%p1704_p8), %s2142_s0, 512, %s2149_s14, %s2153_s17, %s1606_s1, %s1607_s3, %s1608_s9  }
 0x273   : > { %s1222_s15 = sshll.u32 %s2093_s20, 3 }
 0x274   : > { %s356_s10 = sadd.s32 %s1222_s15, %s1221_s13 }
 0x275   : > { %s1223_s25 = sshll.u32 %s356_s10, 3 }
 0x276   : > { %s358_s19 = scalar_lea.vmem %s2220_s6, %s1223_s25 }
 0x2e7   : > { %v995_v6 = vpop.xlane.xlu0 %994 }
 0x2e8   : > { %1001 = vst.msk [vmem:[%s358_s19 + $0x8] sm:$0xff] %vm971_vm11, %v995_v6  ;;  %v993_v8 = vpop.xlane.xlu1 %992 }
 0x2e9   : > { %1000 = vst.msk [vmem:[%s358_s19] sm:$0xff] %vm971_vm11, %v993_v8 }
 0x2eb   : > { %v999_v10 = vpop.xlane.xlu0 %998 }
 0x2ec   : > { %1003 = vst.msk [vmem:[%s358_s19 + $0x18] sm:$0xff] %vm971_vm11, %v999_v10  ;;  %v997_v39 = vpop.xlane.xlu1 %996 }
 0x2ed   : > { %1002 = vst.msk [vmem:[%s358_s19 + $0x10] sm:$0xff] %vm971_vm11, %v997_v39 }
 0x2ee PF: > { %p1433_p8 = scmp.ge.s32.totalorder %s1600_s28, 2  ;;  %s1058_s11 = sand.u32 1, %s1572_s21  }
 0x2ef   : > { %s1059_s20 = scalar_lea.sflag [#allocation4], %s1058_s11 }
 0x2f0   : > { %p1430_p7 = pnand %p1433_p8, %p1708_p9 }
 0x2f2   : > { %1567 = dma.done.wait (!%p1430_p7), %s1059_s20, 512  }
 0x2f3   : > { %1569 = vsyncadd (!%p1430_p7), %s1059_s20, 4294966784  ;;  %s20_s28 = sadd.s32 1, %s1600_s28   ;;  %s2234_s21 = smov %s1576_s22 }
 0x2f4   : > { %p17_p10 = scmp.ge.s32.totalorder %s20_s28, 6   ;;  %s2235_s22 = smov %s1580_s23 }
 0x2f5   : > { %s2236_s23 = smov %s1716_s16  ;;  %s2237_s24 = smov %s1592_s26 }
 0x2f6   : > { %s2238_s25 = smov %s1596_s27  ;;  %s2239_s26 = smov %s2242_s7 }
 0x2f7   : > { %s2240_s27 = smov %s2246_s8  ;;  %19 = sbr.rel (!%p17_p10) target bundleno = 10 (0xa), region = 138 }
 0x2fe   :  { %1088 = vsyncpa [#allocation4], 1 }
 0x2ff   :  { %1090 = vsyncpa [#allocation4 + $0x1], 1 }

</bundles_post_ra>
